<compile_context>
chip_gen: v6e
topology: v6e:2x2x1
jax: 0.10.0
libtpu: 0.0.40
codegen_flags: <defaults>
</compile_context>

<pallas_src>
import functools

import jax
import jax.numpy as jnp
from jax.experimental import pallas as pl
from jax.experimental.pallas import tpu as pltpu

BIG = 1e12  # matches the 1e12 constant in the PyTorch reference


def _round_up(x, m):
    return (x + m - 1) // m * m


def _cdiv(a, b):
    return (a + b - 1) // b


def _vmem_capacity_bytes():
    try:
        cap = getattr(pltpu.get_tpu_info(), "vmem_capacity_bytes", None)
        if cap:
            return int(cap)
    except Exception:
        pass
    return 64 * 1024 * 1024  # conservative fallback (v7x per-TC physical)


def ensemble_kernel(w_ref, x_ref, y_ref, pred_ref, loss_ref, *,
                    num_classes, num_members, flat):
    J = num_classes

    def member(k):
        if flat:
            # static, 128-aligned lane slice of the flattened (tb, K*J) block
            return x_ref[:, k * J:(k + 1) * J]
        return x_ref[:, k, :]

    # ----- ensemble combine: pred[b, j] = sum_k softmax(w)[k] * x[b, k, j] -----
    # Unrolled scalar-weighted accumulate: scalar reads from SMEM, dense (tb, J)
    # slabs on the VPU; no broadcast temporary, no cross-sublane reduction.
    acc = w_ref[0] * member(0).astype(jnp.float32)
    for k in range(1, num_members):
        acc = acc + w_ref[k] * member(k).astype(jnp.float32)
    pred_ref[...] = acc.astype(pred_ref.dtype)

    # ----- multilabel categorical cross entropy (per row) ----------------------
    y = y_ref[...].astype(jnp.float32)
    is_pos = y > 0.5                                      # labels in {0, 1}

    # (1 - 2y) * pred with the +/-BIG masking folded into selects.
    neg_logits = jnp.where(is_pos, -BIG, acc)
    pos_logits = jnp.where(is_pos, -acc, -BIG)

    def lse_with_zero(v):
        # logsumexp over the last dim with an implicit extra 0 entry appended
        m = jnp.maximum(jnp.max(v, axis=-1, keepdims=True), 0.0)     # (tb, 1)
        s = jnp.sum(jnp.exp(v - m), axis=-1, keepdims=True) + jnp.exp(-m)
        return m + jnp.log(s)                                        # (tb, 1)

    loss_ref[...] = lse_with_zero(neg_logits) + lse_with_zero(pos_logits)


def my_model_forward(weight, x, y, *, block_rows=None):
    """weight: (K,) raw params, x: (B, K, J) member logits, y: (B, J) multi-hot labels."""
    B, K, J = x.shape
    assert y.shape == (B, J)

    x_isz = jnp.dtype(x.dtype).itemsize
    y_isz = jnp.dtype(y.dtype).itemsize
    Jp = _round_up(J, 128)
    flat = (J % 128 == 0)

    # ----- per-step VMEM footprint (double-buffered in/out blocks), per batch row -----
    if flat:
        x_row_bytes = K * J * x_isz                 # fully lane-dense, no sublane padding
    else:
        x_row_bytes = max(K, 8) * Jp * x_isz        # (K, J) tile -> K padded to 8 sublanes
    per_row = 2 * (x_row_bytes + Jp * y_isz + Jp * x_isz) + 2 * 4

    # ----- per-generation VMEM budget / explicit scoped limit -----
    cap = _vmem_capacity_bytes()
    budget = min(int(cap * 0.45), 56 * 1024 * 1024)  # ~29 MiB on v7x (64 MiB/TC), ~56 MiB on v5e/v6e

    if block_rows is None:
        tb = max(8, (budget // per_row) // 8 * 8)
        # Keep several grid steps (megacore on v7x + pipeline overlap) without shrinking
        # tiles below ~512 rows.
        cap_rows = max(512, _round_up(_cdiv(B, 4), 8))
        tb = min(tb, cap_rows)
    else:
        tb = max(8, _round_up(block_rows, 8))
    tb = min(tb, _round_up(B, 8))
    nb = _cdiv(B, tb)                               # ragged final block allowed (no batch pad)

    vmem_need = tb * per_row + (1 << 20)
    vmem_limit = int(min(0.9 * cap, max(2 * vmem_need, 32 * 1024 * 1024)))

    # Softmax over the ensemble weights, hoisted out of the gridded kernel.
    w = jax.nn.softmax(weight.reshape(-1).astype(jnp.float32), axis=0)

    # ----- specs -----
    if flat:
        x_in = x.reshape(B, K * J)                  # free metadata reshape (row-major)
        x_spec = pl.BlockSpec((tb, K * J), lambda i: (i, 0))
    else:
        x_in = x
        x_spec = pl.BlockSpec((tb, K, J), lambda i: (i, 0, 0))   # full (K, J) block, no pad

    kernel = functools.partial(ensemble_kernel, num_classes=J, num_members=K, flat=flat)

    cost = pl.CostEstimate(
        flops=int(2 * B * K * J + 10 * B * J),
        transcendentals=int(2 * B * J + 4 * B),
        bytes_accessed=int(B * K * J * x_isz + B * J * y_isz + B * J * x_isz + B * 4),
    )

    pred, row_loss = pl.pallas_call(
        kernel,
        out_shape=(
            jax.ShapeDtypeStruct((B, J), x.dtype),
            jax.ShapeDtypeStruct((B, 1), jnp.float32),
        ),
        grid_spec=pltpu.PrefetchScalarGridSpec(
            num_scalar_prefetch=0,
            grid=(nb,),
            in_specs=[
                pl.BlockSpec(memory_space=pltpu.MemorySpace.SMEM),   # softmaxed weights (K,)
                x_spec,                                              # x tile (contiguous DMA)
                pl.BlockSpec((tb, J), lambda i: (i, 0)),             # y tile
            ],
            out_specs=(
                pl.BlockSpec((tb, J), lambda i: (i, 0)),             # pred tile
                pl.BlockSpec((tb, 1), lambda i: (i, 0)),             # per-row loss
            ),
        ),
        compiler_params=pltpu.CompilerParams(
            dimension_semantics=("parallel",),                       # shard batch tiles across TCs
            vmem_limit_bytes=vmem_limit,
        ),
        cost_estimate=cost,
    )(w, x_in, y)

    loss = jnp.mean(row_loss[:, 0])
    return pred, loss


def reference_forward(weight, x, y):
    w = jax.nn.softmax(weight.astype(jnp.float32))
    pred = jnp.einsum("k,bkj->bj", w, x.astype(jnp.float32))
    yt = y.astype(jnp.float32)
    yp = (1.0 - 2.0 * yt) * pred
    yp_neg = yp - yt * BIG
    yp_pos = yp - (1.0 - yt) * BIG
    zeros = jnp.zeros_like(yp[..., :1])
    neg = jax.nn.logsumexp(jnp.concatenate([yp_neg, zeros], axis=-1), axis=-1)
    pos = jax.nn.logsumexp(jnp.concatenate([yp_pos, zeros], axis=-1), axis=-1)
    return pred, jnp.mean(neg + pos)


if __name__ == "__main__":
    key = jax.random.PRNGKey(0)

    # Case 1: small shapes, J not lane-aligned -> 3-D full-(K,J) block path, single
    # partial batch block (B=2 < tb=8).
    B, K, J = 2, 4, 32
    kw, kx, ky = jax.random.split(key, 3)
    weight = jax.random.normal(kw, (K,), dtype=jnp.float32)
    x = jax.random.normal(kx, (B, K, J), dtype=jnp.float32)
    y = jax.random.bernoulli(ky, p=0.2, shape=(B, J)).astype(jnp.float32)

    pred, loss = my_model_forward(weight, x, y)
    jax.block_until_ready((pred, loss))
    pred_ref, loss_ref = reference_forward(weight, x, y)
    assert jnp.allclose(pred, pred_ref, atol=1e-4, rtol=1e-4)
    assert jnp.allclose(loss, loss_ref, atol=1e-3, rtol=1e-3)

    # Case 2: lane-aligned J -> flattened-x fast path, multi-block grid with a ragged
    # final batch block (B=70, tb=32 -> blocks of 32/32/6).
    B2, K2, J2 = 70, 3, 128
    kw2, kx2, ky2 = jax.random.split(jax.random.PRNGKey(1), 3)
    weight2 = jax.random.normal(kw2, (K2,), dtype=jnp.float32)
    x2 = jax.random.normal(kx2, (B2, K2, J2), dtype=jnp.float32)
    y2 = jax.random.bernoulli(ky2, p=0.1, shape=(B2, J2)).astype(jnp.float32)

    pred2, loss2 = my_model_forward(weight2, x2, y2, block_rows=32)
    jax.block_until_ready((pred2, loss2))
    pred2_ref, loss2_ref = reference_forward(weight2, x2, y2)
    assert jnp.allclose(pred2, pred2_ref, atol=1e-4, rtol=1e-4)
    assert jnp.allclose(loss2, loss2_ref, atol=1e-3, rtol=1e-3)

    print("KERNEL_OK")
</pallas_src>

<mosaic_0001>
module attributes {stable_mosaic.version = 11 : i64} {
  func.func @ensemble_kernel(%arg0: i32, %arg1: memref<4xf32, #tpu.memory_space<smem>>, %arg2: memref<8x4x32xf32, #tpu.memory_space<vmem>>, %arg3: memref<8x32xf32, #tpu.memory_space<vmem>>, %arg4: memref<8x32xf32, #tpu.memory_space<vmem>>, %arg5: memref<8x1xf32, #tpu.memory_space<vmem>>) attributes {dimension_semantics = [#tpu.dimension_semantics<parallel>], iteration_bounds = array<i64: 1>, scalar_prefetch = 0 : i64, scratch_operands = 0 : i64, tpu.core_type = #tpu.core_type<tc>, window_params = [{transform_indices = @transform_0, window_bounds = array<i64: 4>}, {transform_indices = @transform_1, window_bounds = array<i64: 8, 4, 32>}, {transform_indices = @transform_2, window_bounds = array<i64: 8, 32>}, {transform_indices = @transform_3, window_bounds = array<i64: 8, 32>}, {transform_indices = @transform_4, window_bounds = array<i64: 8, 1>}]} {
    %c0 = arith.constant 0 : index
    %0 = memref.load %arg1[%c0] : memref<4xf32, #tpu.memory_space<smem>>
    %c0_0 = arith.constant 0 : index
    %c0_1 = arith.constant 0 : index
    %c0_2 = arith.constant 0 : index
    %1 = vector.load %arg2[%c0_0, %c0_1, %c0_2] : memref<8x4x32xf32, #tpu.memory_space<vmem>>, vector<8x1x32xf32>
    %2 = vector.shape_cast %1 : vector<8x1x32xf32> to vector<8x32xf32>
    %3 = vector.broadcast %0 : f32 to vector<8x32xf32>
    %4 = arith.mulf %3, %2 : vector<8x32xf32>
    %c1 = arith.constant 1 : index
    %5 = memref.load %arg1[%c1] : memref<4xf32, #tpu.memory_space<smem>>
    %c0_3 = arith.constant 0 : index
    %c1_4 = arith.constant 1 : index
    %c0_5 = arith.constant 0 : index
    %6 = vector.load %arg2[%c0_3, %c1_4, %c0_5] : memref<8x4x32xf32, #tpu.memory_space<vmem>>, vector<8x1x32xf32>
    %7 = vector.shape_cast %6 : vector<8x1x32xf32> to vector<8x32xf32>
    %8 = vector.broadcast %5 : f32 to vector<8x32xf32>
    %9 = arith.mulf %8, %7 : vector<8x32xf32>
    %10 = arith.addf %4, %9 : vector<8x32xf32>
    %c2 = arith.constant 2 : index
    %11 = memref.load %arg1[%c2] : memref<4xf32, #tpu.memory_space<smem>>
    %c0_6 = arith.constant 0 : index
    %c2_7 = arith.constant 2 : index
    %c0_8 = arith.constant 0 : index
    %12 = vector.load %arg2[%c0_6, %c2_7, %c0_8] : memref<8x4x32xf32, #tpu.memory_space<vmem>>, vector<8x1x32xf32>
    %13 = vector.shape_cast %12 : vector<8x1x32xf32> to vector<8x32xf32>
    %14 = vector.broadcast %11 : f32 to vector<8x32xf32>
    %15 = arith.mulf %14, %13 : vector<8x32xf32>
    %16 = arith.addf %10, %15 : vector<8x32xf32>
    %c3 = arith.constant 3 : index
    %17 = memref.load %arg1[%c3] : memref<4xf32, #tpu.memory_space<smem>>
    %c0_9 = arith.constant 0 : index
    %c3_10 = arith.constant 3 : index
    %c0_11 = arith.constant 0 : index
    %18 = vector.load %arg2[%c0_9, %c3_10, %c0_11] : memref<8x4x32xf32, #tpu.memory_space<vmem>>, vector<8x1x32xf32>
    %19 = vector.shape_cast %18 : vector<8x1x32xf32> to vector<8x32xf32>
    %20 = vector.broadcast %17 : f32 to vector<8x32xf32>
    %21 = arith.mulf %20, %19 : vector<8x32xf32>
    %22 = arith.addf %16, %21 : vector<8x32xf32>
    %c0_12 = arith.constant 0 : index
    %c0_13 = arith.constant 0 : index
    %23 = vector.load %arg4[%c0_12, %c0_13] : memref<8x32xf32, #tpu.memory_space<vmem>>, vector<8x32xf32>
    tpu.vector_store %arg4[%c0_12, %c0_13], %22 {strides = array<i32>} : memref<8x32xf32, #tpu.memory_space<vmem>>, vector<8x32xf32>,
    %c0_14 = arith.constant 0 : index
    %c0_15 = arith.constant 0 : index
    %24 = vector.load %arg3[%c0_14, %c0_15] : memref<8x32xf32, #tpu.memory_space<vmem>>, vector<8x32xf32>
    %cst = arith.constant 5.000000e-01 : f32
    %25 = vector.broadcast %cst : f32 to vector<8x32xf32>
    %26 = arith.cmpf ogt, %24, %25 : vector<8x32xf32>
    %cst_16 = arith.constant -9.99999995E+11 : f32
    %27 = vector.broadcast %cst_16 : f32 to vector<8x32xf32>
    %28 = arith.select %26, %27, %22 : vector<8x32xi1>, vector<8x32xf32>
    %cst_17 = arith.constant 0.000000e+00 : f32
    %29 = vector.broadcast %cst_17 : f32 to vector<8x32xf32>
    %30 = arith.subf %29, %22 : vector<8x32xf32>
    %cst_18 = arith.constant -9.99999995E+11 : f32
    %31 = vector.broadcast %cst_18 : f32 to vector<8x32xf32>
    %32 = arith.select %26, %30, %31 : vector<8x32xi1>, vector<8x32xf32>
    %cst_19 = arith.constant dense<0xFF800000> : vector<8xf32>
    %33 = vector.multi_reduction <maximumf>, %28, %cst_19 [1] : vector<8x32xf32> to vector<8xf32>
    %34 = vector.shape_cast %33 : vector<8xf32> to vector<8x1xf32>
    %cst_20 = arith.constant 0.000000e+00 : f32
    %35 = vector.broadcast %cst_20 : f32 to vector<8x1xf32>
    %36 = arith.maximumf %34, %35 : vector<8x1xf32>
    %37 = vector.broadcast %36 : vector<8x1xf32> to vector<8x32xf32>
    %38 = arith.subf %28, %37 : vector<8x32xf32>
    %39 = math.exp %38 : vector<8x32xf32>
    %cst_21 = arith.constant dense<0.000000e+00> : vector<8xf32>
    %40 = vector.multi_reduction <add>, %39, %cst_21 [1] : vector<8x32xf32> to vector<8xf32>
    %41 = vector.shape_cast %40 : vector<8xf32> to vector<8x1xf32>
    %cst_22 = arith.constant 0.000000e+00 : f32
    %42 = vector.broadcast %cst_22 : f32 to vector<8x1xf32>
    %43 = arith.subf %42, %36 : vector<8x1xf32>
    %44 = math.exp %43 : vector<8x1xf32>
    %45 = arith.addf %41, %44 : vector<8x1xf32>
    %46 = math.log %45 : vector<8x1xf32>
    %47 = arith.addf %36, %46 : vector<8x1xf32>
    %cst_23 = arith.constant dense<0xFF800000> : vector<8xf32>
    %48 = vector.multi_reduction <maximumf>, %32, %cst_23 [1] : vector<8x32xf32> to vector<8xf32>
    %49 = vector.shape_cast %48 : vector<8xf32> to vector<8x1xf32>
    %cst_24 = arith.constant 0.000000e+00 : f32
    %50 = vector.broadcast %cst_24 : f32 to vector<8x1xf32>
    %51 = arith.maximumf %49, %50 : vector<8x1xf32>
    %52 = vector.broadcast %51 : vector<8x1xf32> to vector<8x32xf32>
    %53 = arith.subf %32, %52 : vector<8x32xf32>
    %54 = math.exp %53 : vector<8x32xf32>
    %cst_25 = arith.constant dense<0.000000e+00> : vector<8xf32>
    %55 = vector.multi_reduction <add>, %54, %cst_25 [1] : vector<8x32xf32> to vector<8xf32>
    %56 = vector.shape_cast %55 : vector<8xf32> to vector<8x1xf32>
    %cst_26 = arith.constant 0.000000e+00 : f32
    %57 = vector.broadcast %cst_26 : f32 to vector<8x1xf32>
    %58 = arith.subf %57, %51 : vector<8x1xf32>
    %59 = math.exp %58 : vector<8x1xf32>
    %60 = arith.addf %56, %59 : vector<8x1xf32>
    %61 = math.log %60 : vector<8x1xf32>
    %62 = arith.addf %51, %61 : vector<8x1xf32>
    %63 = arith.addf %47, %62 : vector<8x1xf32>
    %c0_27 = arith.constant 0 : index
    %c0_28 = arith.constant 0 : index
    %64 = vector.load %arg5[%c0_27, %c0_28] : memref<8x1xf32, #tpu.memory_space<vmem>>, vector<8x1xf32>
    tpu.vector_store %arg5[%c0_27, %c0_28], %63 {strides = array<i32>} : memref<8x1xf32, #tpu.memory_space<vmem>>, vector<8x1xf32>,
    return
  }
  func.func @transform_0(%arg0: i32) -> i32 {
    %c0_i32 = arith.constant 0 : i32
    %c0_i32_0 = arith.constant 0 : i32
    return %c0_i32 : i32
  }
  func.func @transform_1(%arg0: i32) -> (i32, i32, i32) {
    %c0_i32 = arith.constant 0 : i32
    %c0_i32_0 = arith.constant 0 : i32
    %c0_i32_1 = arith.constant 0 : i32
    return %arg0, %c0_i32, %c0_i32_0 : i32, i32, i32
  }
  func.func @transform_2(%arg0: i32) -> (i32, i32) {
    %c0_i32 = arith.constant 0 : i32
    %c0_i32_0 = arith.constant 0 : i32
    return %arg0, %c0_i32 : i32, i32
  }
  func.func @transform_3(%arg0: i32) -> (i32, i32) {
    %c0_i32 = arith.constant 0 : i32
    %c0_i32_0 = arith.constant 0 : i32
    return %arg0, %c0_i32 : i32, i32
  }
  func.func @transform_4(%arg0: i32) -> (i32, i32) {
    %c0_i32 = arith.constant 0 : i32
    %c0_i32_0 = arith.constant 0 : i32
    return %arg0, %c0_i32 : i32, i32
  }
}

</mosaic_0001>

<bundles_post_ra>
// kernel: tpu_custom_call.1
= control target key start
LH: loop header
LB: loop body
LE: loop exit
PB: predicated region body
PF: predicated region fallthrough
CT: control target
= control target key end

     0   :  { %10 = vsyncpa [#allocation5], 0  ;;  %s451_s0 = inlined_call_operand.hbm [shape: f32[4], index: 0, kind: input, shape index: {}]   ;;  %s452_s1 = inlined_call_operand.hbm [shape: f32[2,4,32], index: 1, kind: input, shape index: {}]   ;;  %s453_s2 = inlined_call_operand.vmem [shape: f32[2,32], index: 2, kind: input, shape index: {}]   ;;  %s454_s3 = inlined_call_operand.hbm [shape: f32[2,32], index: 3, kind: output, shape index: {0}]   ;;  %s455_s4 = inlined_call_operand.vmem [shape: f32[2,1], index: 4, kind: output, shape index: {1}]  }
   0x1   :  { %11 = vsyncpa [#allocation3], 0 }
   0x2   :  { %12 = vsyncpa [#allocation4], 0  ;;  %s377_s15 = smov [#allocation2]  }
   0x3   :  { %20 = dma.hbm_to_smem %s451_s0, 16, %s377_s15, [#allocation5]  }
   0x4   :  { %25 = vsyncadd [#allocation3], 384  ;;  %s378_s18 = smov [#allocation6]  }
   0x5   :  { %s26_s19 = sshll.u32 %s378_s18, 4  ;;  %s27_s19 = int_to_ptr.vmem [resolvable:$true] %s26_s19 }
   0x6   :  { %s339_s20 = scalar_lea.vmem %s27_s19, 128  ;;  %s343_s21 = scalar_lea.vmem %s27_s19, 512 }
   0x7   :  { %p340_p0 = scmp.ne.s32.totalorder %s27_s19, %s339_s20  ;;  %p344_p1 = scmp.lt.s32.totalorder %s27_s19, %s27_s19 }
   0x8   :  { %p345_p2 = scmp.lt.s32.totalorder %s343_s21, %s339_s20 }
   0xa   :  { %p346_p3 = por %p345_p2, %p344_p1 }
   0xc   :  { %p347_p4 = pnand %p346_p3, %p340_p0 }
   0xe   :  { %350 = shalt.err (!%p347_p4)
}
   0xf   :  { %s379_s22 = smov 64   ;;  %s380_s23 = smov 4  }
  0x10   :  { %32 = dma.hbm_to_vmem [thread:$0]  %s452_s1, 128, %s27_s19, [#allocation3], %s379_s22, %s379_s22, %s380_s23  }
  0x11   :  { %371 = dma.done.wait [#allocation5], 16  }
  0x12   :  { %372 = vsyncadd [#allocation5], 4294967280 }
  0x13   :  { %373 = dma.done.wait [#allocation3], 512  }
  0x14   :  { %374 = vsyncadd [#allocation3], 4294966784 }
  0x15   :  { %41 = sfence }
  0x16   :  { %s42_s0 = sld [smem:[#allocation2]]  ;;  %v43_v0 = vld [vmem:[#allocation6] sm:$0x1]  ;;  %v44_v1 = vld [vmem:[#allocation6 + $0x4] sm:$0x1]  ;;  %vm147_vm0 = vcmask 1041409  }
  0x17   :  { %s301_s26 = sld [smem:[#allocation2 + $0x1]]  ;;  %v45_v2 = vld [vmem:[#allocation6 + $0x8] sm:$0x1]  ;;  %v46_v3 = vld [vmem:[#allocation6 + $0xc] sm:$0x1]  ;;  %vm150_vm1 = vcmask 1042434  }
  0x18   :  { %v47_v4 = vld [vmem:[#allocation6 + $0x10] sm:$0x1]  ;;  %v48_v5 = vld [vmem:[#allocation6 + $0x14] sm:$0x1]  ;;  %v49_v6 = vld [vmem:[#allocation6 + $0x18] sm:$0x1] }
  0x19   :  { %v50_v7 = vld [vmem:[#allocation6 + $0x1c] sm:$0x1]  ;;  %v61_v9 = vld [vmem:[#allocation6 + $0x1] sm:$0x1]  ;;  %v62_v10 = vld [vmem:[#allocation6 + $0x5] sm:$0x1] }
  0x1a   :  { %s415_s27 = sld [smem:[#allocation2 + $0x2]]  ;;  %v63_v12 = vld [vmem:[#allocation6 + $0x9] sm:$0x1]  ;;  %v64_v13 = vld [vmem:[#allocation6 + $0xd] sm:$0x1]  ;;  %vm153_vm2 = vcmask 1043459  }
  0x1b   :  { %v65_v14 = vld [vmem:[#allocation6 + $0x11] sm:$0x1]  ;;  %v66_v19 = vld [vmem:[#allocation6 + $0x15] sm:$0x1]  ;;  %v67_v20 = vld [vmem:[#allocation6 + $0x19] sm:$0x1] }
  0x1c   :  { %v51_v8 = vstv %s42_s0  ;;  %v68_v21 = vld [vmem:[#allocation6 + $0x1d] sm:$0x1]  ;;  %v87_v34 = vld [vmem:[#allocation6 + $0x2] sm:$0x1]  ;;  %v88_v35 = vld [vmem:[#allocation6 + $0x6] sm:$0x1] }
  0x1d   :  { %v52_v11 = vmul.f32 %v51_v8, %v43_v0  ;;  %v53_v15 = vmul.f32 %v51_v8, %v44_v1  ;;  %v54_v16 = vmul.f32 %v51_v8, %v45_v2  ;;  %v55_v17 = vmul.f32 %v51_v8, %v46_v3  ;;  %s417_s1 = sld [smem:[#allocation2 + $0x3]]  ;;  %v89_v37 = vld [vmem:[#allocation6 + $0xa] sm:$0x1]  ;;  %v90_v38 = vld [vmem:[#allocation6 + $0xe] sm:$0x1] }
  0x1e   :  { %v56_v18 = vmul.f32 %v51_v8, %v47_v4  ;;  %v57_v22 = vmul.f32 %v51_v8, %v48_v5  ;;  %v58_v23 = vmul.f32 %v51_v8, %v49_v6  ;;  %v59_v24 = vmul.f32 %v51_v8, %v50_v7  ;;  %v91_v39 = vld [vmem:[#allocation6 + $0x12] sm:$0x1]  ;;  %v92_v44 = vld [vmem:[#allocation6 + $0x16] sm:$0x1]  ;;  %v93_v45 = vld [vmem:[#allocation6 + $0x1a] sm:$0x1] }
  0x1f   :  { %v69_v25 = vstv %s301_s26  ;;  %v94_v46 = vld [vmem:[#allocation6 + $0x1e] sm:$0x1]  ;;  %v113_v59 = vld [vmem:[#allocation6 + $0x3] sm:$0x1]  ;;  %v114_v60 = vld [vmem:[#allocation6 + $0x7] sm:$0x1] }
  0x20   :  { %v70_v26 = vmul.f32 %v69_v25, %v61_v9  ;;  %v71_v27 = vmul.f32 %v69_v25, %v62_v10  ;;  %v72_v28 = vmul.f32 %v69_v25, %v63_v12  ;;  %v73_v29 = vmul.f32 %v69_v25, %v64_v13  ;;  %v115_v61 = vld [vmem:[#allocation6 + $0xb] sm:$0x1]  ;;  %v116_v0 = vld [vmem:[#allocation6 + $0xf] sm:$0x1]  ;;  %v117_v1 = vld [vmem:[#allocation6 + $0x13] sm:$0x1] }
  0x21   :  { %v74_v30 = vmul.f32 %v69_v25, %v65_v14  ;;  %v75_v31 = vmul.f32 %v69_v25, %v66_v19  ;;  %v76_v32 = vmul.f32 %v69_v25, %v67_v20  ;;  %v77_v33 = vmul.f32 %v69_v25, %v68_v21  ;;  %v118_v6 = vld [vmem:[#allocation6 + $0x17] sm:$0x1]  ;;  %v119_v7 = vld [vmem:[#allocation6 + $0x1b] sm:$0x1]  ;;  %v120_v8 = vld [vmem:[#allocation6 + $0x1f] sm:$0x1] }
  0x22   :  { %v78_v36 = vadd.f32 %v70_v26, %v52_v11  ;;  %v79_v40 = vadd.f32 %v71_v27, %v53_v15  ;;  %v80_v41 = vadd.f32 %v72_v28, %v54_v16  ;;  %v81_v42 = vadd.f32 %v73_v29, %v55_v17 }
  0x23   :  { %v82_v43 = vadd.f32 %v74_v30, %v56_v18  ;;  %v83_v47 = vadd.f32 %v75_v31, %v57_v22  ;;  %v84_v48 = vadd.f32 %v76_v32, %v58_v23  ;;  %v85_v49 = vadd.f32 %v77_v33, %v59_v24 }
  0x24   :  { %v95_v50 = vstv %s415_s27  ;;  %v121_v11 = vstv %s417_s1  ;;  %vm156_vm3 = vcmask 1044484   ;;  %vm159_vm4 = vcmask 1045509  }
  0x25   :  { %v96_v51 = vmul.f32 %v95_v50, %v87_v34  ;;  %v97_v52 = vmul.f32 %v95_v50, %v88_v35  ;;  %v98_v53 = vmul.f32 %v95_v50, %v89_v37  ;;  %v99_v54 = vmul.f32 %v95_v50, %v90_v38  ;;  %v170_v38 = vld [vmem:[%s453_s2] sm:$0xff] }
  0x26   :  { %v100_v55 = vmul.f32 %v95_v50, %v91_v39  ;;  %v101_v56 = vmul.f32 %v95_v50, %v92_v44  ;;  %v102_v57 = vmul.f32 %v95_v50, %v93_v45  ;;  %v103_v58 = vmul.f32 %v95_v50, %v94_v46 }
  0x27   :  { %v104_v62 = vadd.f32 %v96_v51, %v78_v36  ;;  %v105_v63 = vadd.f32 %v97_v52, %v79_v40  ;;  %v106_v2 = vadd.f32 %v98_v53, %v80_v41  ;;  %v107_v3 = vadd.f32 %v99_v54, %v81_v42 }
  0x28   :  { %v108_v4 = vadd.f32 %v100_v55, %v82_v43  ;;  %v109_v5 = vadd.f32 %v101_v56, %v83_v47  ;;  %v110_v9 = vadd.f32 %v102_v57, %v84_v48  ;;  %v111_v10 = vadd.f32 %v103_v58, %v85_v49 }
  0x29   :  { %v122_v12 = vmul.f32 %v121_v11, %v113_v59  ;;  %v123_v13 = vmul.f32 %v121_v11, %v114_v60  ;;  %v124_v14 = vmul.f32 %v121_v11, %v115_v61  ;;  %v125_v15 = vmul.f32 %v121_v11, %v116_v0 }
  0x2a   :  { %v126_v16 = vmul.f32 %v121_v11, %v117_v1  ;;  %v127_v17 = vmul.f32 %v121_v11, %v118_v6  ;;  %v128_v18 = vmul.f32 %v121_v11, %v119_v7  ;;  %v129_v19 = vmul.f32 %v121_v11, %v120_v8 }
  0x2b   :  { %v130_v20 = vadd.f32 %v122_v12, %v104_v62  ;;  %v131_v21 = vadd.f32 %v123_v13, %v105_v63  ;;  %v132_v22 = vadd.f32 %v124_v14, %v106_v2  ;;  %v133_v23 = vadd.f32 %v125_v15, %v107_v3 }
  0x2c   :  { %v134_v24 = vadd.f32 %v126_v16, %v108_v4  ;;  %v135_v25 = vadd.f32 %v127_v17, %v109_v5  ;;  %v136_v26 = vadd.f32 %v128_v18, %v110_v9  ;;  %v137_v27 = vadd.f32 %v129_v19, %v111_v10 }
  0x2d   :  { %v146_v28 = vrot.slane %v131_v21, 7  ;;  %v149_v29 = vrot.slane %v132_v22, 6  ;;  %v152_v30 = vrot.slane %v133_v23, 5  ;;  %vm162_vm5 = vcmask 1046534  }
  0x2e   :  { %v155_v31 = vrot.slane %v134_v24, 4  ;;  %v158_v32 = vrot.slane %v135_v25, 3  ;;  %vm165_vm6 = vcmask 1047559   ;;  %v161_v34 = vrot.slane %v136_v26, 2 }
  0x2f   :  { %v148_v33 = vsel %vm147_vm0, %v146_v28, %v130_v20  ;;  %v164_v35 = vrot.slane %v137_v27, 1  ;;  %v173_v36 = vsub.f32 0.0, %v130_v20  ;;  %v174_v39 = vsub.f32 0.0, %v131_v21 }
  0x30   :  { %v151_v37 = vsel %vm150_vm1, %v149_v29, %v148_v33  ;;  %v175_v40 = vsub.f32 0.0, %v132_v22  ;;  %v176_v41 = vsub.f32 0.0, %v133_v23  ;;  %v177_v43 = vsub.f32 0.0, %v134_v24 }
  0x31   :  { %v154_v42 = vsel %vm153_vm2, %v152_v30, %v151_v37  ;;  %v178_v44 = vsub.f32 0.0, %v135_v25  ;;  %v179_v45 = vsub.f32 0.0, %v136_v26  ;;  %v180_v47 = vsub.f32 0.0, %v137_v27 }
  0x32   :  { %v157_v46 = vsel %vm156_vm3, %v155_v31, %v154_v42  ;;  %v189_v48 = vrot.slane %v174_v39, 7  ;;  %v191_v49 = vrot.slane %v175_v40, 6  ;;  %vm171_vm7 = vcmp.gt.f32.partialorder %v170_v38, 0.5 }
  0x33   :  { %v160_v50 = vsel %vm159_vm4, %v158_v32, %v157_v46  ;;  %v193_v51 = vrot.slane %v176_v41, 5  ;;  %v195_v52 = vrot.slane %v177_v43, 4  ;;  %vm168_vm8 = vcmask 261120  }
  0x34   :  { %v163_v53 = vsel %vm162_vm5, %v161_v34, %v160_v50  ;;  %v190_v54 = vsel %vm147_vm0, %v189_v48, %v173_v36  ;;  %v197_v55 = vrot.slane %v178_v44, 3  ;;  %v199_v58 = vrot.slane %v179_v45, 2 }
  0x35   :  { %v166_v56 = vsel %vm165_vm6, %v164_v35, %v163_v53  ;;  %v192_v57 = vsel %vm150_vm1, %v191_v49, %v190_v54  ;;  %v201_v61 = vrot.slane %v180_v47, 1  ;;  %vm240_vm9 = vcmask 7168  }
  0x36   :  { %v172_v59 = vsel %vm171_vm7, -1e+12, %v166_v56  ;;  %169 = vst.msk [vmem:[#allocation7] sm:$0xff] %vm168_vm8, %v166_v56  ;;  %v194_v60 = vsel %vm153_vm2, %v193_v51, %v192_v57 }
  0x37   :  { %v205_v62 = vsel %vm168_vm8, %v172_v59, -inf  ;;  %v196_v63 = vsel %vm156_vm3, %v195_v52, %v194_v60 }
  0x38   :  { %206 = vmax.xlane.f32.xlu0 %v205_v62  ;;  %v198_v0 = vsel %vm159_vm4, %v197_v55, %v196_v63 }
  0x39   :  { %v200_v1 = vsel %vm162_vm5, %v199_v58, %v198_v0 }
  0x3a   :  { %v202_v2 = vsel %vm165_vm6, %v201_v61, %v200_v1 }
  0x3b   :  { %v204_v3 = vsel %vm171_vm7, %v202_v2, -1e+12 }
  0x3c   :  { %v222_v4 = vsel %vm168_vm8, %v204_v3, -inf }
  0x3d   :  { %223 = vmax.xlane.f32.xlu0 %v222_v4 }
  0xc1   :  { %v207_v5 = vpop.xlane.xlu0 %206 }
  0xc2   :  { %v208_v6 = vmax.f32 %v207_v5, 0.0 }
  0xc4   :  { %v209_v7 = vsub.f32 %v172_v59, %v208_v6  ;;  %v215_v17 = vsub.f32 0.0, %v208_v6 }
  0xc6   :  { %v210_v8 = vmul.f32 1.442695, %v209_v7  ;;  %v224_v9 = vpop.xlane.xlu0 %223  ;;  %v216_v18 = vmul.f32 1.442695, %v215_v17 }
  0xc7   :  { %v225_v10 = vmax.f32 %v224_v9, 0.0 }
  0xc8   :  { %311 = vpow2.f32 %v210_v8 }
  0xc9   :  { %v226_v11 = vsub.f32 %v204_v3, %v225_v10  ;;  %v232_v19 = vsub.f32 0.0, %v225_v10 }
  0xcb   :  { %v227_v12 = vmul.f32 1.442695, %v226_v11  ;;  %v233_v20 = vmul.f32 1.442695, %v232_v19 }
  0xcd   :  { %313 = vpow2.f32 %v227_v12 }
  0xce   :  { %315 = vpow2.f32 %v216_v18 }
  0xcf   :  { %317 = vpow2.f32 %v233_v20 }
  0xd5   :  { %v312_v13 = vpop.eup %311 }
  0xd6   :  { %v212_v14 = vsel %vm168_vm8, %v312_v13, 0.0 }
  0xd7   :  { %213 = vadd.xlane.f32.xlu1 %v212_v14 }
  0xda   :  { %v314_v15 = vpop.eup %313 }
  0xdb   :  { %v229_v16 = vsel %vm168_vm8, %v314_v15, 0.0  ;;  %v316_v21 = vpop.eup %315 }
  0xdc   :  { %230 = vadd.xlane.f32.xlu1 %v229_v16  ;;  %v318_v24 = vpop.eup %317 }
 0x160   :  { %v214_v22 = vpop.xlane.xlu1 %213 }
 0x161   :  { %v218_v23 = vadd.f32 %v316_v21, %v214_v22 }
 0x163   :  { %319 = vlog2.f32 %v218_v23 }
 0x165   :  { %v231_v25 = vpop.xlane.xlu1 %230 }
 0x166   :  { %v235_v26 = vadd.f32 %v318_v24, %v231_v25 }
 0x168   :  { %321 = vlog2.f32 %v235_v26 }
 0x170   :  { %v320_v27 = vpop.eup %319 }
 0x171   :  { %v220_v28 = vmul.f32 0.6931472, %v320_v27 }
 0x173   :  { %v221_v31 = vadd.f32 %v220_v28, %v208_v6 }
 0x175   :  { %v322_v29 = vpop.eup %321 }
 0x176   :  { %v237_v30 = vmul.f32 0.6931472, %v322_v29 }
 0x178   :  { %v238_v32 = vadd.f32 %v237_v30, %v225_v10 }
 0x17a   :  { %v239_v33 = vadd.f32 %v238_v32, %v221_v31 }
 0x17c   :  { %241 = vst.msk [vmem:[#allocation8] sm:$0xff] %vm240_vm9, %v239_v33 }
 0x17d   :  { %246 = vsyncadd [#allocation4], 96  ;;  %s381_s2 = smov [#allocation7]  }
 0x17e   :  { %s247_s30 = sshll.u32 %s381_s2, 4  ;;  %s248_s30 = int_to_ptr.vmem [resolvable:$true] %s247_s30 }
 0x17f   :  { %s351_s7 = scalar_lea.vmem %s248_s30, 32  ;;  %s355_s8 = scalar_lea.vmem %s248_s30, 128 }
 0x180   :  { %p352_p5 = scmp.ne.s32.totalorder %s248_s30, %s351_s7  ;;  %p356_p6 = scmp.lt.s32.totalorder %s248_s30, %s248_s30 }
 0x181   :  { %p357_p7 = scmp.lt.s32.totalorder %s355_s8, %s351_s7 }
 0x183   :  { %v272_v34 = vld [vmem:[#allocation8] sm:$0x3]  ;;  %p358_p8 = por %p357_p7, %p356_p6 }
 0x184   :  { %273 = vst [vmem:[%s455_s4] sm:$0x3] %v272_v34 }
 0x185   :  { %p359_p9 = pnand %p358_p8, %p352_p5 }
 0x187   :  { %362 = shalt.err (!%p359_p9)
}
 0x188   :  { %s382_s9 = smov 32   ;;  %s383_s10 = smov 2  }
 0x189   :  { %253 = dma.vmem_to_hbm [thread:$0]  %s248_s30, 32, %s454_s3, [#allocation4], %s382_s9, %s382_s9, %s383_s10  }
 0x18a   :  { %375 = dma.done.wait [#allocation4], 128  }
 0x18b   :  { %376 = vsyncadd [#allocation4], 4294967168 }
 0x18c   :  { %294 = vsyncpa [#allocation3], 1 }
 0x18d   :  { %295 = vsyncpa [#allocation4], 1 }
 0x18e   :  { %296 = vsyncpa [#allocation5], 1 }

</bundles_post_ra>
